<compile_context>
chip_gen: v7x
topology: tpu7x:2x2x1
jax: 0.10.0
libtpu: 0.0.40
codegen_flags: <defaults>
</compile_context>

<pallas_src>
import functools

import jax
import jax.numpy as jnp
from jax.experimental import pallas as pl
from jax.experimental.pallas import tpu as pltpu


def _round_up(x, m):
    return ((x + m - 1) // m) * m


def _encoder_kernel(x_ref, w1_ref, b1_ref, w2_ref, b2_ref, *rest, apply_dropout):
    if apply_dropout:
        mask_ref, o_ref = rest
    else:
        (o_ref,) = rest

    # First linear on the MXU: bf16 inputs, f32 accumulation.
    x = x_ref[...].astype(jnp.bfloat16)
    h = jnp.dot(x, w1_ref[...], preferred_element_type=jnp.float32)
    h = jnp.maximum(h + b1_ref[...], 0.0)          # bias + ReLU in f32 (VPU)

    if apply_dropout:
        # mask is a pre-scaled keep mask: 0.0 or 1/(1-p).  One multiply.
        h = h * mask_ref[...]

    # Second linear: (tb, H) @ (H, D_out_pad) -> (tb, D_out_pad).
    # D_out is padded to 128 lanes in the wrapper so this store is unmasked.
    y = jnp.dot(h.astype(jnp.bfloat16), w2_ref[...],
                preferred_element_type=jnp.float32)
    y = y + b2_ref[...]
    o_ref[...] = y.astype(o_ref.dtype)


def make_dropout_mask(key, p, shape, dtype=jnp.float32):
    """Inverted-dropout keep mask: entries are 0 or 1/(1-p)."""
    assert 0.0 < p < 1.0, "dropout_p must be in (0, 1) for the training path"
    keep = jax.random.bernoulli(key, 1.0 - p, shape)
    return keep.astype(dtype) * (1.0 / (1.0 - p))


def encoder_forward(feat, params, *, dropout_mask=None, batch_tile=128):
    """Fused Pallas forward pass of the Encoder MLP.

    feat:         (B, input_dim) float32
    params:       dict with w1 (input_dim, hidden), b1 (1, hidden),
                            w2 (hidden, out_dim),  b2 (1, out_dim)
    dropout_mask: None for eval mode; for train mode a (B, hidden) pre-scaled
                  keep mask (see make_dropout_mask).
    batch_tile:   rows per MXU pass; 128 works everywhere, 256 preferred on
                  v6e/v7x (full 256-row systolic array).
    """
    B, d_in = feat.shape
    hidden = params["w1"].shape[1]
    d_out = params["w2"].shape[1]

    # Cast weights once so the MXU sees native bf16 and the W1 DMA is halved;
    # biases stay f32 for the elementwise math.
    w1 = params["w1"].astype(jnp.bfloat16)
    w2 = params["w2"].astype(jnp.bfloat16)
    b1 = params["b1"].reshape(1, hidden).astype(jnp.float32)
    b2 = params["b2"].reshape(1, d_out).astype(jnp.float32)

    # Lane-dense output: pad the (tiny) output feature dim to 128 lanes so the
    # kernel's store is a full-width unmasked vst.  Extra columns are zeros and
    # get sliced off below.
    d_out_pad = max(_round_up(d_out, 128), 128)
    if d_out_pad != d_out:
        w2 = jnp.pad(w2, ((0, 0), (0, d_out_pad - d_out)))
        b2 = jnp.pad(b2, ((0, 0), (0, d_out_pad - d_out)))

    bt = batch_tile
    B_pad = _round_up(B, bt)
    feat_p = jnp.pad(feat, ((0, B_pad - B), (0, 0))) if B_pad != B else feat

    training = dropout_mask is not None

    inputs = [feat_p, w1, b1, w2, b2]
    in_specs = [
        pl.BlockSpec((bt, d_in), lambda i: (i, 0)),          # x tile
        pl.BlockSpec((d_in, hidden), lambda i: (0, 0)),      # W1 (whole, resident)
        pl.BlockSpec((1, hidden), lambda i: (0, 0)),         # b1
        pl.BlockSpec((hidden, d_out_pad), lambda i: (0, 0)), # W2 (whole, padded)
        pl.BlockSpec((1, d_out_pad), lambda i: (0, 0)),      # b2 (padded)
    ]

    bytes_accessed = (feat_p.size * feat_p.dtype.itemsize
                      + w1.size * 2 + w2.size * 2
                      + b1.size * 4 + b2.size * 4
                      + B_pad * d_out_pad * feat.dtype.itemsize)

    if training:
        mask = dropout_mask.astype(jnp.float32)
        assert mask.shape == (B, hidden), "dropout_mask must be (B, hidden)"
        if B_pad != B:
            mask = jnp.pad(mask, ((0, B_pad - B), (0, 0)))
        inputs.append(mask)
        in_specs.append(pl.BlockSpec((bt, hidden), lambda i: (i, 0)))
        bytes_accessed += mask.size * 4

    flops = 2 * B_pad * (d_in * hidden + hidden * d_out_pad)

    out = pl.pallas_call(
        functools.partial(_encoder_kernel, apply_dropout=training),
        out_shape=jax.ShapeDtypeStruct((B_pad, d_out_pad), feat.dtype),
        grid=(B_pad // bt,),
        in_specs=in_specs,
        out_specs=pl.BlockSpec((bt, d_out_pad), lambda i: (i, 0)),
        compiler_params=pltpu.CompilerParams(
            dimension_semantics=("parallel",),
            vmem_limit_bytes=32 * 1024 * 1024,
        ),
        cost_estimate=pl.CostEstimate(
            flops=flops, transcendentals=0, bytes_accessed=bytes_accessed),
    )(*inputs)
    return out[:B, :d_out]


def init_encoder_params(key, input_dim, hidden, out_dim, dtype=jnp.float32):
    """Deterministic synthetic init mimicking nn.Linear's U(-1/sqrt(fan_in), +)."""
    k1, k2, k3, k4 = jax.random.split(key, 4)
    lim1 = 1.0 / jnp.sqrt(input_dim)
    lim2 = 1.0 / jnp.sqrt(hidden)
    return {
        "w1": jax.random.uniform(k1, (input_dim, hidden), dtype, -lim1, lim1),
        "b1": jax.random.uniform(k2, (1, hidden), dtype, -lim1, lim1),
        "w2": jax.random.uniform(k3, (hidden, out_dim), dtype, -lim2, lim2),
        "b2": jax.random.uniform(k4, (1, out_dim), dtype, -lim2, lim2),
    }


def encoder_reference(feat, params, dropout_mask=None):
    """Pure-JAX reference mirroring the kernel's bf16-dot / f32-accumulate path."""
    w1 = params["w1"].astype(jnp.bfloat16)
    w2 = params["w2"].astype(jnp.bfloat16)
    h = jnp.dot(feat.astype(jnp.bfloat16), w1, preferred_element_type=jnp.float32)
    h = jnp.maximum(h + params["b1"], 0.0)
    if dropout_mask is not None:
        h = h * dropout_mask
    y = jnp.dot(h.astype(jnp.bfloat16), w2, preferred_element_type=jnp.float32)
    return (y + params["b2"]).astype(feat.dtype)


if __name__ == "__main__":
    # Small shapes consistent with the module (real module: 2816 -> 512 -> 8).
    B, INPUT_DIM, HIDDEN, OUT_DIM = 8, 256, 128, 8

    key = jax.random.PRNGKey(0)
    kf, kp, km = jax.random.split(key, 3)
    feat = jax.random.normal(kf, (B, INPUT_DIM), dtype=jnp.float32)
    params = init_encoder_params(kp, INPUT_DIM, HIDDEN, OUT_DIM)

    # Eval-mode forward (Dropout == identity), matches PyTorch module.eval().
    out = jax.block_until_ready(encoder_forward(feat, params))
    ref = encoder_reference(feat, params)
    assert out.shape == (B, OUT_DIM)
    assert jnp.allclose(out, ref, atol=1e-3, rtol=1e-3), "eval mismatch vs reference"

    # Train-mode forward: dropout mask sampled host-side, applied in-kernel.
    mask = make_dropout_mask(km, 0.5, (B, HIDDEN))
    out_t = jax.block_until_ready(encoder_forward(feat, params, dropout_mask=mask))
    ref_t = encoder_reference(feat, params, dropout_mask=mask)
    assert out_t.shape == (B, OUT_DIM)
    assert jnp.allclose(out_t, ref_t, atol=1e-3, rtol=1e-3), "train mismatch vs reference"

    print("KERNEL_OK")
</pallas_src>

<mosaic_0001>
module attributes {stable_mosaic.version = 11 : i64} {
  func.func @_encoder_kernel(%arg0: i32, %arg1: memref<128x256xf32, #tpu.memory_space<vmem>>, %arg2: memref<256x128xbf16, #tpu.memory_space<vmem>>, %arg3: memref<1x128xf32, #tpu.memory_space<vmem>>, %arg4: memref<128x128xbf16, #tpu.memory_space<vmem>>, %arg5: memref<1x128xf32, #tpu.memory_space<vmem>>, %arg6: memref<128x128xf32, #tpu.memory_space<vmem>>) attributes {dimension_semantics = [#tpu.dimension_semantics<parallel>], iteration_bounds = array<i64: 1>, scalar_prefetch = 0 : i64, scratch_operands = 0 : i64, tpu.core_type = #tpu.core_type<tc>, window_params = [{transform_indices = @transform_0, window_bounds = array<i64: 128, 256>}, {pipeline_mode = #tpu.pipeline_mode<synchronous>, transform_indices = @transform_1, window_bounds = array<i64: 256, 128>}, {pipeline_mode = #tpu.pipeline_mode<synchronous>, transform_indices = @transform_2, window_bounds = array<i64: 1, 128>}, {pipeline_mode = #tpu.pipeline_mode<synchronous>, transform_indices = @transform_3, window_bounds = array<i64: 128, 128>}, {pipeline_mode = #tpu.pipeline_mode<synchronous>, transform_indices = @transform_4, window_bounds = array<i64: 1, 128>}, {transform_indices = @transform_5, window_bounds = array<i64: 128, 128>}]} {
    %c0 = arith.constant 0 : index
    %c0_0 = arith.constant 0 : index
    %0 = vector.load %arg1[%c0, %c0_0] : memref<128x256xf32, #tpu.memory_space<vmem>>, vector<128x256xf32>
    %1 = arith.truncf %0 : vector<128x256xf32> to vector<128x256xbf16>
    %c0_1 = arith.constant 0 : index
    %c0_2 = arith.constant 0 : index
    %2 = vector.load %arg2[%c0_1, %c0_2] : memref<256x128xbf16, #tpu.memory_space<vmem>>, vector<256x128xbf16>
    %cst = arith.constant dense<0.000000e+00> : vector<128x128xf32>
    %3 = tpu.matmul %1, %2, %cst {dimension_numbers = #tpu.dot_dimension_numbers<[1], [0], [0], [1], [0, 0, 1, 1], [], []>} : vector<128x256xbf16>, vector<256x128xbf16>, vector<128x128xf32> -> vector<128x128xf32>
    %c0_3 = arith.constant 0 : index
    %c0_4 = arith.constant 0 : index
    %4 = vector.load %arg3[%c0_3, %c0_4] : memref<1x128xf32, #tpu.memory_space<vmem>>, vector<1x128xf32>
    %5 = vector.broadcast %4 : vector<1x128xf32> to vector<128x128xf32>
    %6 = arith.addf %3, %5 : vector<128x128xf32>
    %cst_5 = arith.constant 0.000000e+00 : f32
    %7 = vector.broadcast %cst_5 : f32 to vector<128x128xf32>
    %8 = arith.maximumf %6, %7 : vector<128x128xf32>
    %9 = arith.truncf %8 : vector<128x128xf32> to vector<128x128xbf16>
    %c0_6 = arith.constant 0 : index
    %c0_7 = arith.constant 0 : index
    %10 = vector.load %arg4[%c0_6, %c0_7] : memref<128x128xbf16, #tpu.memory_space<vmem>>, vector<128x128xbf16>
    %cst_8 = arith.constant dense<0.000000e+00> : vector<128x128xf32>
    %11 = tpu.matmul %9, %10, %cst_8 {dimension_numbers = #tpu.dot_dimension_numbers<[1], [0], [0], [1], [0, 0, 1, 1], [], []>} : vector<128x128xbf16>, vector<128x128xbf16>, vector<128x128xf32> -> vector<128x128xf32>
    %c0_9 = arith.constant 0 : index
    %c0_10 = arith.constant 0 : index
    %12 = vector.load %arg5[%c0_9, %c0_10] : memref<1x128xf32, #tpu.memory_space<vmem>>, vector<1x128xf32>
    %13 = vector.broadcast %12 : vector<1x128xf32> to vector<128x128xf32>
    %14 = arith.addf %11, %13 : vector<128x128xf32>
    %c0_11 = arith.constant 0 : index
    %c0_12 = arith.constant 0 : index
    %15 = vector.load %arg6[%c0_11, %c0_12] : memref<128x128xf32, #tpu.memory_space<vmem>>, vector<128x128xf32>
    tpu.vector_store %arg6[%c0_11, %c0_12], %14 {strides = array<i32>} : memref<128x128xf32, #tpu.memory_space<vmem>>, vector<128x128xf32>,
    return
  }
  func.func @transform_0(%arg0: i32) -> (i32, i32) {
    %c0_i32 = arith.constant 0 : i32
    %c0_i32_0 = arith.constant 0 : i32
    return %arg0, %c0_i32 : i32, i32
  }
  func.func @transform_1(%arg0: i32) -> (i32, i32) {
    %c0_i32 = arith.constant 0 : i32
    %c0_i32_0 = arith.constant 0 : i32
    %c0_i32_1 = arith.constant 0 : i32
    return %c0_i32, %c0_i32_0 : i32, i32
  }
  func.func @transform_2(%arg0: i32) -> (i32, i32) {
    %c0_i32 = arith.constant 0 : i32
    %c0_i32_0 = arith.constant 0 : i32
    %c0_i32_1 = arith.constant 0 : i32
    return %c0_i32, %c0_i32_0 : i32, i32
  }
  func.func @transform_3(%arg0: i32) -> (i32, i32) {
    %c0_i32 = arith.constant 0 : i32
    %c0_i32_0 = arith.constant 0 : i32
    %c0_i32_1 = arith.constant 0 : i32
    return %c0_i32, %c0_i32_0 : i32, i32
  }
  func.func @transform_4(%arg0: i32) -> (i32, i32) {
    %c0_i32 = arith.constant 0 : i32
    %c0_i32_0 = arith.constant 0 : i32
    %c0_i32_1 = arith.constant 0 : i32
    return %c0_i32, %c0_i32_0 : i32, i32
  }
  func.func @transform_5(%arg0: i32) -> (i32, i32) {
    %c0_i32 = arith.constant 0 : i32
    %c0_i32_0 = arith.constant 0 : i32
    return %arg0, %c0_i32 : i32, i32
  }
}

</mosaic_0001>

<bundles_post_ra>
// kernel: tpu_custom_call.1
= control target key start
LH: loop header
LB: loop body
LE: loop exit
PB: predicated region body
PF: predicated region fallthrough
CT: control target
= control target key end

     0   :  { %10 = vsyncpa [#allocation3], 0  ;;  %s953_s0 = inlined_call_operand.hbm [shape: f32[128,256], index: 0, kind: input, shape index: {}]   ;;  %s954_s1 = inlined_call_operand.hbm [shape: bf16[256,128], index: 1, kind: input, shape index: {}]   ;;  %s955_s2 = inlined_call_operand.vmem [shape: f32[1,128], index: 2, kind: input, shape index: {}]   ;;  %s956_s3 = inlined_call_operand.hbm [shape: bf16[128,128], index: 3, kind: input, shape index: {}]   ;;  %s957_s4 = inlined_call_operand.vmem [shape: f32[1,128], index: 4, kind: input, shape index: {}]   ;;  %s958_s5 = inlined_call_operand.hbm [shape: f32[128,128], index: 5, kind: output, shape index: {}]  }
   0x1   :  { %11 = vsyncpa [#allocation6], 0 }
   0x2   :  { %12 = vsyncpa [#allocation4], 0  ;;  %s835_s18 = smov [#allocation5]   ;;  %s741_s22 = scalar_lea.hbm %s954_s1, 2048 }
   0x3   :  { %s30_s19 = sshll.u32 %s835_s18, 4  ;;  %p742_p0 = scmp.ne.s32.totalorder %s954_s1, %s741_s22  ;;  %s31_s19 = int_to_ptr.vmem [resolvable:$true] %s30_s19 }
   0x4   :  { %p745_p1 = scmp.lt.u32.totalorder %s741_s22, %s954_s1 }
   0x6   :  { %p747_p2 = pnand %p745_p1, %p742_p0 }
   0x8   :  { %750 = shalt.err (!%p747_p2)
}
   0x9   :  { %s751_s27 = scalar_lea.vmem %s31_s19, 2048  ;;  %p756_p4 = scmp.lt.s32.totalorder %s31_s19, %s31_s19 }
   0xa   :  { %p752_p3 = scmp.ne.s32.totalorder %s31_s19, %s751_s27  ;;  %p757_p5 = scmp.lt.s32.totalorder %s751_s27, %s751_s27 }
   0xc   :  { %p758_p6 = por %p757_p5, %p756_p4 }
   0xe   :  { %p759_p7 = pnand %p758_p6, %p752_p3 }
  0x10   :  { %762 = shalt.err (!%p759_p7)
}
  0x11   :  { %s836_s28 = smov 64   ;;  %s837_s29 = smov 4  }
  0x12   :  { %36 = dma.hbm_to_vmem [thread:$0]  %s954_s1, 2048, %s31_s19, [#allocation6], %s836_s28, %s836_s28, %s837_s29  }
  0x13   :  { %s838_s7 = smov [#allocation2]   ;;  %s763_s11 = scalar_lea.hbm %s953_s0, 4096 }
  0x14   :  { %s18_s8 = sshll.u32 %s838_s7, 4  ;;  %p764_p8 = scmp.ne.s32.totalorder %s953_s0, %s763_s11  ;;  %s19_s8 = int_to_ptr.vmem [resolvable:$true] %s18_s8 }
  0x15   :  { %p767_p9 = scmp.lt.u32.totalorder %s763_s11, %s953_s0 }
  0x17   :  { %p769_p10 = pnand %p767_p9, %p764_p8 }
  0x19   :  { %772 = shalt.err (!%p769_p10)
}
  0x1a   :  { %s773_s16 = scalar_lea.vmem %s19_s8, 4096  ;;  %p778_p12 = scmp.lt.s32.totalorder %s19_s8, %s19_s8 }
  0x1b   :  { %p774_p11 = scmp.ne.s32.totalorder %s19_s8, %s773_s16  ;;  %p779_p13 = scmp.lt.s32.totalorder %s773_s16, %s773_s16 }
  0x1d   :  { %p780_p0 = por %p779_p13, %p778_p12 }
  0x1f   :  { %p781_p1 = pnand %p780_p0, %p774_p11 }
  0x21   :  { %784 = shalt.err (!%p781_p1)
}
  0x22   :  { %s839_s1 = smov 256   ;;  %s840_s17 = smov 16  }
  0x23   :  { %24 = dma.hbm_to_vmem [thread:$0]  %s953_s0, 4096, %s19_s8, [#allocation3], %s839_s1, %s839_s1, %s840_s17  }
  0x24   :  { %s841_s20 = smov [#allocation7]   ;;  %s785_s24 = scalar_lea.hbm %s956_s3, 1024 }
  0x25   :  { %s44_s21 = sshll.u32 %s841_s20, 4  ;;  %p786_p2 = scmp.ne.s32.totalorder %s956_s3, %s785_s24  ;;  %s45_s21 = int_to_ptr.vmem [resolvable:$true] %s44_s21 }
  0x26   :  { %p789_p3 = scmp.lt.u32.totalorder %s785_s24, %s956_s3 }
  0x28   :  { %p791_p4 = pnand %p789_p3, %p786_p2 }
  0x2a   :  { %794 = shalt.err (!%p791_p4)
}
  0x2b   :  { %s795_s6 = scalar_lea.vmem %s45_s21, 1024  ;;  %p800_p6 = scmp.lt.s32.totalorder %s45_s21, %s45_s21 }
  0x2c   :  { %p796_p5 = scmp.ne.s32.totalorder %s45_s21, %s795_s6  ;;  %p801_p7 = scmp.lt.s32.totalorder %s795_s6, %s795_s6 }
  0x2e   :  { %p802_p8 = por %p801_p7, %p800_p6 }
  0x30   :  { %p803_p9 = pnand %p802_p8, %p796_p5 }
  0x32   :  { %806 = shalt.err (!%p803_p9)
}
  0x33   :  { %50 = dma.hbm_to_vmem [thread:$0]  %s956_s3, 1024, %s45_s21, [#allocation6], %s836_s28, %s836_s28, %s837_s29  }
  0x34   :  { %829 = dma.done.wait [#allocation3], 4096  }
  0x35   :  { %830 = vsyncadd [#allocation3], 4294963200 }
  0x36   :  { %831 = dma.done.wait [#allocation6], 3072  }
  0x37   :  { %832 = vsyncadd [#allocation6], 4294964224  ;;  %v717_v0 = vld [vmem:[#allocation5 + $0x40] sm:$0xff]   ;;  %v719_v2 = vld [vmem:[#allocation5 + $0x48] sm:$0xff]  }
  0x38   :  { %v718_v1 = vld [vmem:[#allocation5] sm:$0xff]   ;;  %595 = vmatprep.subr.bf16.mxu0 %v717_v0  ;;  %v720_v3 = vld [vmem:[#allocation5 + $0x8] sm:$0xff]   ;;  %v721_v4 = vld [vmem:[#allocation5 + $0x50] sm:$0xff]  }
  0x39   :  { %596 = vmatpush3.bf16.msra.mxu0 %v718_v1  ;;  %v722_v5 = vld [vmem:[#allocation5 + $0x10] sm:$0xff]   ;;  %v723_v6 = vld [vmem:[#allocation5 + $0x58] sm:$0xff]   ;;  %v725_v8 = vld [vmem:[#allocation5 + $0x60] sm:$0xff]  }
  0x3a   :  { %597 = vmatprep.subr.bf16.mxu0 %v719_v2  ;;  %v724_v7 = vld [vmem:[#allocation5 + $0x18] sm:$0xff]   ;;  %v726_v9 = vld [vmem:[#allocation5 + $0x20] sm:$0xff]   ;;  %v727_v10 = vld [vmem:[#allocation5 + $0x68] sm:$0xff]  }
  0x3b   :  { %v64_v11 = vld [vmem:[#allocation2 + $0x8] sm:$0xff]  ;;  %v66_v12 = vld [vmem:[#allocation2 + $0x18] sm:$0xff]  ;;  %v729_v15 = vld [vmem:[#allocation5 + $0x70] sm:$0xff]  }
  0x3c   :  { %v96_v13 = vpack.c.bf16 %v66_v12, %v64_v11  ;;  %v728_v14 = vld [vmem:[#allocation5 + $0x28] sm:$0xff]   ;;  %v730_v16 = vld [vmem:[#allocation5 + $0x30] sm:$0xff]   ;;  %v731_v17 = vld [vmem:[#allocation5 + $0x78] sm:$0xff]  }
  0x3d   :  { %598 = vmatpush3.bf16.msra.mxu0 %v720_v3  ;;  %v732_v18 = vld [vmem:[#allocation5 + $0x38] sm:$0xff]   ;;  %v63_v19 = vld [vmem:[#allocation2] sm:$0xff]  ;;  %v65_v20 = vld [vmem:[#allocation2 + $0x10] sm:$0xff] }
  0x3e   :  { %599 = vmatprep.subr.bf16.mxu0 %v721_v4  ;;  %278 = vmatprep.mubr.bf16.mxu0 %v96_v13  ;;  %v68_v21 = vld [vmem:[#allocation2 + $0x28] sm:$0xff]  ;;  %v70_v22 = vld [vmem:[#allocation2 + $0x38] sm:$0xff]  ;;  %v733_v23 = vld [vmem:[#allocation7] sm:$0xff]   ;;  %v95_v26 = vpack.c.bf16 %v65_v20, %v63_v19 }
  0x3f   :  { %v734_v24 = vld [vmem:[#allocation7 + $0x8] sm:$0xff]   ;;  %675 = vmatprep.subr.bf16.mxu1 %v733_v23  ;;  %v735_v25 = vld [vmem:[#allocation7 + $0x10] sm:$0xff]   ;;  %v98_v27 = vpack.c.bf16 %v70_v22, %v68_v21  ;;  %v67_v28 = vld [vmem:[#allocation2 + $0x20] sm:$0xff] }
  0x40   :  { %676 = vmatpush3.bf16.msra.mxu1 %v733_v23  ;;  %v69_v29 = vld [vmem:[#allocation2 + $0x30] sm:$0xff]  ;;  %v72_v30 = vld [vmem:[#allocation2 + $0x48] sm:$0xff]  ;;  %v74_v31 = vld [vmem:[#allocation2 + $0x58] sm:$0xff] }
  0x41   :  { %600 = vmatpush3.bf16.msra.mxu0 %v722_v5  ;;  %677 = vmatprep.subr.bf16.mxu1 %v734_v24  ;;  %v97_v32 = vpack.c.bf16 %v69_v29, %v67_v28  ;;  %v100_v33 = vpack.c.bf16 %v74_v31, %v72_v30  ;;  %v71_v34 = vld [vmem:[#allocation2 + $0x40] sm:$0xff]  ;;  %v73_v35 = vld [vmem:[#allocation2 + $0x50] sm:$0xff]  ;;  %v76_v36 = vld [vmem:[#allocation2 + $0x68] sm:$0xff] }
  0x42   :  { %601 = vmatprep.subr.bf16.mxu0 %v723_v6  ;;  %v78_v37 = vld [vmem:[#allocation2 + $0x78] sm:$0xff]  ;;  %v99_v38 = vpack.c.bf16 %v73_v35, %v71_v34  ;;  %v75_v40 = vld [vmem:[#allocation2 + $0x60] sm:$0xff]  ;;  %v77_v41 = vld [vmem:[#allocation2 + $0x70] sm:$0xff] }
  0x43   :  { %v102_v39 = vpack.c.bf16 %v78_v37, %v76_v36  ;;  %v80_v42 = vld [vmem:[#allocation2 + $0x88] sm:$0xff]  ;;  %v82_v43 = vld [vmem:[#allocation2 + $0x98] sm:$0xff]  ;;  %v101_v44 = vpack.c.bf16 %v77_v41, %v75_v40  ;;  %v79_v46 = vld [vmem:[#allocation2 + $0x80] sm:$0xff] }
  0x44   :  { %678 = vmatpush3.bf16.msra.mxu1 %v734_v24  ;;  %v104_v45 = vpack.c.bf16 %v82_v43, %v80_v42  ;;  %v81_v47 = vld [vmem:[#allocation2 + $0x90] sm:$0xff]  ;;  %v84_v48 = vld [vmem:[#allocation2 + $0xa8] sm:$0xff]  ;;  %v86_v49 = vld [vmem:[#allocation2 + $0xb8] sm:$0xff] }
  0x45   :  { %602 = vmatpush3.bf16.msra.mxu0 %v724_v7  ;;  %679 = vmatprep.subr.bf16.mxu1 %v735_v25  ;;  %v103_v50 = vpack.c.bf16 %v81_v47, %v79_v46  ;;  %v106_v51 = vpack.c.bf16 %v86_v49, %v84_v48  ;;  %v83_v52 = vld [vmem:[#allocation2 + $0xa0] sm:$0xff]  ;;  %v85_v53 = vld [vmem:[#allocation2 + $0xb0] sm:$0xff]  ;;  %v88_v54 = vld [vmem:[#allocation2 + $0xc8] sm:$0xff] }
  0x46   :  { %603 = vmatprep.subr.bf16.mxu0 %v725_v8  ;;  %v90_v55 = vld [vmem:[#allocation2 + $0xd8] sm:$0xff]  ;;  %v105_v56 = vpack.c.bf16 %v85_v53, %v83_v52  ;;  %v87_v58 = vld [vmem:[#allocation2 + $0xc0] sm:$0xff]  ;;  %v89_v59 = vld [vmem:[#allocation2 + $0xd0] sm:$0xff] }
  0x47   :  { %v108_v57 = vpack.c.bf16 %v90_v55, %v88_v54  ;;  %v92_v60 = vld [vmem:[#allocation2 + $0xe8] sm:$0xff]  ;;  %v94_v61 = vld [vmem:[#allocation2 + $0xf8] sm:$0xff]  ;;  %v107_v62 = vpack.c.bf16 %v89_v59, %v87_v58  ;;  %v91_v0 = vld [vmem:[#allocation2 + $0xe0] sm:$0xff] }
  0x48   :  { %680 = vmatpush3.bf16.msra.mxu1 %v735_v25  ;;  %v110_v63 = vpack.c.bf16 %v94_v61, %v92_v60  ;;  %v93_v1 = vld [vmem:[#allocation2 + $0xf0] sm:$0xff]  ;;  %v736_v3 = vld [vmem:[#allocation7 + $0x18] sm:$0xff]   ;;  %v737_v4 = vld [vmem:[#allocation7 + $0x20] sm:$0xff]  }
  0x49   :  { %604 = vmatpush3.bf16.msra.mxu0 %v726_v9  ;;  %v109_v2 = vpack.c.bf16 %v93_v1, %v91_v0  ;;  %681 = vmatprep.subr.bf16.mxu1 %v736_v3  ;;  %v738_v5 = vld [vmem:[#allocation7 + $0x28] sm:$0xff]   ;;  %v739_v6 = vld [vmem:[#allocation7 + $0x30] sm:$0xff]   ;;  %v740_v7 = vld [vmem:[#allocation7 + $0x38] sm:$0xff]  }
  0x4a   :  { %605 = vmatprep.subr.bf16.mxu0 %v727_v10  ;;  %v920_v10 = vld [vmem:[%s955_s2] ss:$0 sm:$0xff] }
  0x4c   :  { %682 = vmatpush3.bf16.msra.mxu1 %v736_v3 }
  0x4d   :  { %606 = vmatpush3.bf16.msra.mxu0 %v728_v14  ;;  %683 = vmatprep.subr.bf16.mxu1 %v737_v4 }
  0x4e   :  { %607 = vmatprep.subr.bf16.mxu0 %v729_v15 }
  0x50   :  { %684 = vmatpush3.bf16.msra.mxu1 %v737_v4 }
  0x51   :  { %608 = vmatpush3.bf16.msra.mxu0 %v730_v16  ;;  %685 = vmatprep.subr.bf16.mxu1 %v738_v5 }
  0x52   :  { %609 = vmatprep.subr.bf16.mxu0 %v731_v17 }
  0x54   :  { %686 = vmatpush3.bf16.msra.mxu1 %v738_v5 }
  0x55   :  { %610 = vmatpush3.bf16.msra.mxu0 %v732_v18  ;;  %687 = vmatprep.subr.bf16.mxu1 %v739_v6 }
  0x58   :  { %279 = vmatmul.mubr.bf16.vlgmr.msra.gmra.mrb[0].mxu0 %v95_v26  ;;  %688 = vmatpush3.bf16.msra.mxu1 %v739_v6 }
  0x59   :  { %286 = vmatprep.mubr.bf16.mxu0 %v98_v27  ;;  %689 = vmatprep.subr.bf16.mxu1 %v740_v7 }
  0x5c   :  { %690 = vmatpush3.bf16.msra.mxu1 %v740_v7 }
  0x60   :  { %287 = vmatmul.mubr.bf16.gmra.mrb[4].mxu0 %v97_v32 }
  0x61   :  { %294 = vmatprep.mubr.bf16.mxu0 %v100_v33 }
  0x68   :  { %295 = vmatmul.mubr.bf16.gmra.mrb[8].mxu0 %v99_v38 }
  0x69   :  { %302 = vmatprep.mubr.bf16.mxu0 %v102_v39 }
  0x70   :  { %303 = vmatmul.mubr.bf16.gmra.mrb[12].mxu0 %v101_v44 }
  0x71   :  { %310 = vmatprep.mubr.bf16.mxu0 %v104_v45 }
  0x78   :  { %311 = vmatmul.mubr.bf16.gmra.mrb[16].mxu0 %v103_v50 }
  0x79   :  { %318 = vmatprep.mubr.bf16.mxu0 %v106_v51 }
  0x80   :  { %319 = vmatmul.mubr.bf16.gmra.mrb[20].mxu0 %v105_v56 }
  0x81   :  { %326 = vmatprep.mubr.bf16.mxu0 %v108_v57 }
  0x88   :  { %327 = vmatmul.mubr.bf16.gmra.mrb[24].mxu0 %v107_v62 }
  0x89   :  { %334 = vmatprep.mubr.bf16.mxu0 %v110_v63 }
  0x90   :  { %335 = vmatmul.mubr.bf16.gmra.mrb[28].mxu0 %v109_v2 }
 0x12b   :  { %v611_v8 = vpop.f32.mrb[0].mxu0 }
 0x12c   :  { %v612_v9 = vpop.f32.mrb[1].mxu0 }
 0x12d   :  { %v613_v11 = vadd.f32 %v612_v9, %v611_v8  ;;  %v614_v12 = vpop.f32.mrb[2].mxu0 }
 0x12e   :  { %v615_v13 = vpop.f32.mrb[3].mxu0 }
 0x12f   :  { %v616_v14 = vadd.f32 %v615_v13, %v614_v12  ;;  %v281_v15 = vadd.f32 %v613_v11, %v920_v10 }
 0x131   :  { %v284_v16 = vadd.f32 %v616_v14, %v920_v10  ;;  %v343_v18 = vmax.f32 %v281_v15, 0.0 }
 0x133   :  { %v617_v17 = vpop.f32.mrb[4].mxu0  ;;  %v344_v19 = vmax.f32 %v284_v16, 0.0 }
 0x134   :  { %v618_v20 = vpop.f32.mrb[5].mxu0 }
 0x135   :  { %v619_v21 = vadd.f32 %v618_v20, %v617_v17  ;;  %v620_v22 = vpop.f32.mrb[6].mxu0  ;;  %v359_v23 = vpack.c.bf16 %v344_v19, %v343_v18 }
 0x136   :  { %v621_v24 = vpop.f32.mrb[7].mxu0 }
 0x137   :  { %v289_v25 = vadd.f32 %v619_v21, %v920_v10  ;;  %v622_v26 = vadd.f32 %v621_v24, %v620_v22  ;;  %691 = vmatprep.mubr.bf16.mxu1 %v359_v23 }
 0x139   :  { %v292_v27 = vadd.f32 %v622_v26, %v920_v10  ;;  %v345_v28 = vmax.f32 %v289_v25, 0.0 }
 0x13b   :  { %v346_v29 = vmax.f32 %v292_v27, 0.0  ;;  %v623_v30 = vpop.f32.mrb[8].mxu0 }
 0x13c   :  { %v624_v31 = vpop.f32.mrb[9].mxu0 }
 0x13d   :  { %v625_v32 = vadd.f32 %v624_v31, %v623_v30  ;;  %v626_v33 = vpop.f32.mrb[10].mxu0  ;;  %v360_v34 = vpack.c.bf16 %v346_v29, %v345_v28 }
 0x13e   :  { %v627_v35 = vpop.f32.mrb[11].mxu0 }
 0x13f   :  { %v297_v36 = vadd.f32 %v625_v32, %v920_v10  ;;  %v628_v37 = vadd.f32 %v627_v35, %v626_v33  ;;  %692 = vmatmul.mubr.bf16.vlgmr.msra.gmra.mrb[0].mxu1 %v360_v34  ;;  %v586_v34 = vld [vmem:[%s957_s4] ss:$0 sm:$0xff]  ;;  %s842_s4 = smov [#allocation8]  }
 0x140   :  { %s556_s8 = sshll.u32 %s842_s4, 4  ;;  %s557_s8 = int_to_ptr.vmem [resolvable:$true] %s556_s8 }
 0x141   :  { %v300_v38 = vadd.f32 %v628_v37, %v920_v10  ;;  %v347_v39 = vmax.f32 %v297_v36, 0.0  ;;  %s807_s9 = scalar_lea.vmem %s557_s8, 2048  ;;  %p812_p11 = scmp.lt.s32.totalorder %s557_s8, %s557_s8 }
 0x142   :  { %p808_p10 = scmp.ne.s32.totalorder %s557_s8, %s807_s9  ;;  %p813_p12 = scmp.lt.s32.totalorder %s807_s9, %s807_s9 }
 0x143   :  { %v348_v40 = vmax.f32 %v300_v38, 0.0  ;;  %v629_v41 = vpop.f32.mrb[12].mxu0 }
 0x144   :  { %v630_v42 = vpop.f32.mrb[13].mxu0  ;;  %p814_p13 = por %p813_p12, %p812_p11 }
 0x145   :  { %v631_v43 = vadd.f32 %v630_v42, %v629_v41  ;;  %v632_v44 = vpop.f32.mrb[14].mxu0  ;;  %v361_v45 = vpack.c.bf16 %v348_v40, %v347_v39 }
 0x146   :  { %v633_v46 = vpop.f32.mrb[15].mxu0  ;;  %p815_p0 = pnand %p814_p13, %p808_p10 }
 0x147   :  { %v305_v47 = vadd.f32 %v631_v43, %v920_v10  ;;  %v634_v48 = vadd.f32 %v633_v46, %v632_v44  ;;  %695 = vmatprep.mubr.bf16.mxu1 %v361_v45 }
 0x149   :  { %v308_v49 = vadd.f32 %v634_v48, %v920_v10  ;;  %v349_v50 = vmax.f32 %v305_v47, 0.0 }
 0x14b   :  { %v350_v51 = vmax.f32 %v308_v49, 0.0  ;;  %v635_v52 = vpop.f32.mrb[16].mxu0 }
 0x14c   :  { %v636_v53 = vpop.f32.mrb[17].mxu0 }
 0x14d   :  { %v637_v54 = vadd.f32 %v636_v53, %v635_v52  ;;  %v638_v55 = vpop.f32.mrb[18].mxu0  ;;  %v362_v56 = vpack.c.bf16 %v350_v51, %v349_v50 }
 0x14e   :  { %v639_v57 = vpop.f32.mrb[19].mxu0 }
 0x14f   :  { %v313_v58 = vadd.f32 %v637_v54, %v920_v10  ;;  %v640_v59 = vadd.f32 %v639_v57, %v638_v55  ;;  %696 = vmatmul.mubr.bf16.gmra.mrb[4].mxu1 %v362_v56 }
 0x151   :  { %v316_v60 = vadd.f32 %v640_v59, %v920_v10  ;;  %v351_v61 = vmax.f32 %v313_v58, 0.0 }
 0x153   :  { %v352_v62 = vmax.f32 %v316_v60, 0.0  ;;  %v641_v63 = vpop.f32.mrb[20].mxu0 }
 0x154   :  { %v642_v0 = vpop.f32.mrb[21].mxu0 }
 0x155   :  { %v643_v1 = vadd.f32 %v642_v0, %v641_v63  ;;  %v644_v2 = vpop.f32.mrb[22].mxu0  ;;  %v363_v3 = vpack.c.bf16 %v352_v62, %v351_v61 }
 0x156   :  { %v645_v4 = vpop.f32.mrb[23].mxu0 }
 0x157   :  { %v321_v5 = vadd.f32 %v643_v1, %v920_v10  ;;  %v646_v6 = vadd.f32 %v645_v4, %v644_v2  ;;  %699 = vmatprep.mubr.bf16.mxu1 %v363_v3 }
 0x159   :  { %v324_v7 = vadd.f32 %v646_v6, %v920_v10  ;;  %v353_v8 = vmax.f32 %v321_v5, 0.0 }
 0x15b   :  { %v354_v9 = vmax.f32 %v324_v7, 0.0  ;;  %v647_v11 = vpop.f32.mrb[24].mxu0 }
 0x15c   :  { %v648_v12 = vpop.f32.mrb[25].mxu0 }
 0x15d   :  { %v649_v13 = vadd.f32 %v648_v12, %v647_v11  ;;  %v650_v14 = vpop.f32.mrb[26].mxu0  ;;  %v364_v15 = vpack.c.bf16 %v354_v9, %v353_v8 }
 0x15e   :  { %v651_v16 = vpop.f32.mrb[27].mxu0 }
 0x15f   :  { %v329_v17 = vadd.f32 %v649_v13, %v920_v10  ;;  %v652_v18 = vadd.f32 %v651_v16, %v650_v14  ;;  %700 = vmatmul.mubr.bf16.gmra.mrb[8].mxu1 %v364_v15 }
 0x161   :  { %v332_v19 = vadd.f32 %v652_v18, %v920_v10  ;;  %v355_v20 = vmax.f32 %v329_v17, 0.0 }
 0x163   :  { %v356_v21 = vmax.f32 %v332_v19, 0.0  ;;  %v653_v22 = vpop.f32.mrb[28].mxu0 }
 0x164   :  { %v654_v23 = vpop.f32.mrb[29].mxu0 }
 0x165   :  { %v655_v24 = vadd.f32 %v654_v23, %v653_v22  ;;  %v656_v25 = vpop.f32.mrb[30].mxu0  ;;  %v365_v26 = vpack.c.bf16 %v356_v21, %v355_v20 }
 0x166   :  { %v657_v27 = vpop.f32.mrb[31].mxu0 }
 0x167   :  { %v337_v28 = vadd.f32 %v655_v24, %v920_v10  ;;  %v658_v29 = vadd.f32 %v657_v27, %v656_v25  ;;  %703 = vmatprep.mubr.bf16.mxu1 %v365_v26 }
 0x169   :  { %v340_v30 = vadd.f32 %v658_v29, %v920_v10  ;;  %v357_v31 = vmax.f32 %v337_v28, 0.0 }
 0x16b   :  { %v358_v32 = vmax.f32 %v340_v30, 0.0 }
 0x16d   :  { %v366_v33 = vpack.c.bf16 %v358_v32, %v357_v31 }
 0x16f   :  { %704 = vmatmul.mubr.bf16.gmra.mrb[12].mxu1 %v366_v33 }
 0x212   :  { %v693_v35 = vpop.f32.mrb[0].mxu1 }
 0x213   :  { %v481_v36 = vadd.f32 %v693_v35, %v586_v34  ;;  %v472_v37 = vpop.f32.mrb[1].mxu1 }
 0x214   :  { %v473_v38 = vadd.f32 %v586_v34, %v472_v37  ;;  %v694_v39 = vpop.f32.mrb[2].mxu1 }
 0x215   :  { %537 = vst [vmem:[#allocation8 + $0x10] sm:$0xff] %v481_v36  ;;  %v484_v40 = vadd.f32 %v694_v39, %v586_v34  ;;  %v475_v41 = vpop.f32.mrb[3].mxu1 }
 0x216   :  { %535 = vst [vmem:[#allocation8] sm:$0xff] %v473_v38  ;;  %v476_v42 = vadd.f32 %v586_v34, %v475_v41 }
 0x217   :  { %538 = vst [vmem:[#allocation8 + $0x18] sm:$0xff] %v484_v40 }
 0x218   :  { %536 = vst [vmem:[#allocation8 + $0x8] sm:$0xff] %v476_v42 }
 0x222   :  { %v697_v10 = vpop.f32.mrb[4].mxu1 }
 0x223   :  { %v497_v43 = vadd.f32 %v697_v10, %v586_v34  ;;  %v488_v44 = vpop.f32.mrb[5].mxu1 }
 0x224   :  { %v489_v45 = vadd.f32 %v586_v34, %v488_v44  ;;  %v698_v46 = vpop.f32.mrb[6].mxu1 }
 0x225   :  { %541 = vst [vmem:[#allocation8 + $0x30] sm:$0xff] %v497_v43  ;;  %v500_v47 = vadd.f32 %v698_v46, %v586_v34  ;;  %v491_v48 = vpop.f32.mrb[7].mxu1 }
 0x226   :  { %539 = vst [vmem:[#allocation8 + $0x20] sm:$0xff] %v489_v45  ;;  %v492_v49 = vadd.f32 %v586_v34, %v491_v48 }
 0x227   :  { %542 = vst [vmem:[#allocation8 + $0x38] sm:$0xff] %v500_v47 }
 0x228   :  { %540 = vst [vmem:[#allocation8 + $0x28] sm:$0xff] %v492_v49 }
 0x232   :  { %v701_v50 = vpop.f32.mrb[8].mxu1 }
 0x233   :  { %v513_v51 = vadd.f32 %v701_v50, %v586_v34  ;;  %v504_v52 = vpop.f32.mrb[9].mxu1 }
 0x234   :  { %v505_v53 = vadd.f32 %v586_v34, %v504_v52  ;;  %v702_v54 = vpop.f32.mrb[10].mxu1 }
 0x235   :  { %545 = vst [vmem:[#allocation8 + $0x50] sm:$0xff] %v513_v51  ;;  %v516_v55 = vadd.f32 %v702_v54, %v586_v34  ;;  %v507_v56 = vpop.f32.mrb[11].mxu1 }
 0x236   :  { %543 = vst [vmem:[#allocation8 + $0x40] sm:$0xff] %v505_v53  ;;  %v508_v57 = vadd.f32 %v586_v34, %v507_v56 }
 0x237   :  { %546 = vst [vmem:[#allocation8 + $0x58] sm:$0xff] %v516_v55 }
 0x238   :  { %544 = vst [vmem:[#allocation8 + $0x48] sm:$0xff] %v508_v57 }
 0x242   :  { %v705_v58 = vpop.f32.mrb[12].mxu1 }
 0x243   :  { %v529_v59 = vadd.f32 %v705_v58, %v586_v34  ;;  %v520_v60 = vpop.f32.mrb[13].mxu1 }
 0x244   :  { %v521_v61 = vadd.f32 %v586_v34, %v520_v60  ;;  %v706_v62 = vpop.f32.mrb[14].mxu1 }
 0x245   :  { %549 = vst [vmem:[#allocation8 + $0x70] sm:$0xff] %v529_v59  ;;  %v532_v63 = vadd.f32 %v706_v62, %v586_v34  ;;  %v523_v0 = vpop.f32.mrb[15].mxu1 }
 0x246   :  { %547 = vst [vmem:[#allocation8 + $0x60] sm:$0xff] %v521_v61  ;;  %v524_v1 = vadd.f32 %v586_v34, %v523_v0 }
 0x247   :  { %550 = vst [vmem:[#allocation8 + $0x78] sm:$0xff] %v532_v63 }
 0x248   :  { %548 = vst [vmem:[#allocation8 + $0x68] sm:$0xff] %v524_v1 }
 0x249   :  { %818 = shalt.err (!%p815_p0)
}
 0x24a   :  { %s819_s12 = scalar_lea.hbm %s958_s5, 2048 }
 0x24b   :  { %p820_p1 = scmp.ne.s32.totalorder %s958_s5, %s819_s12  ;;  %p823_p2 = scmp.lt.u32.totalorder %s819_s12, %s958_s5 }
 0x24d   :  { %p825_p3 = pnand %p823_p2, %p820_p1 }
 0x24f   :  { %828 = shalt.err (!%p825_p3)
}
 0x250   :  { %s843_s1 = smov 128   ;;  %s844_s17 = smov 8  }
 0x251   :  { %562 = dma.vmem_to_hbm [thread:$0]  %s557_s8, 2048, %s958_s5, [#allocation4], %s843_s1, %s843_s1, %s844_s17  }
 0x252   :  { %833 = dma.done.wait [#allocation4], 2048  }
 0x253   :  { %834 = vsyncadd [#allocation4], 4294965248 }
 0x254   :  { %566 = vsyncpa [#allocation3], 1 }
 0x255   :  { %567 = vsyncpa [#allocation6], 1 }
 0x256   :  { %568 = vsyncpa [#allocation4], 1 }

</bundles_post_ra>
